<compile_context>
chip_gen: v6e
topology: v6e:2x2x1
jax: 0.10.0
libtpu: 0.0.40
codegen_flags: <defaults>
</compile_context>

<pallas_src>
import jax
import jax.numpy as jnp
from jax.experimental import pallas as pl
from jax.experimental.pallas import tpu as pltpu


def _make_kernel(num_classes, unroll):
    """Build the CE-sum kernel for a fixed (static) class count."""

    def kernel(pred_ref, tgt_ref, out_ref):
        # pred_ref: (B_TILE, C, R_TILE, 128) logits (input dtype)
        # tgt_ref : (B_TILE, 1, R_TILE, 128) int8/int32 target class (-1 = pad)
        # out_ref : (B_TILE, 1, 128) f32 per-lane partial CE sums (resident
        #           across the spatial grid axis)
        ri = pl.program_id(1)

        @pl.when(ri == 0)
        def _():
            out_ref[...] = jnp.zeros_like(out_ref)

        t = tgt_ref[:, 0, :, :].astype(jnp.int32)            # (B, R, 128)

        if unroll:
            # Pass 1: running max over class planes (dense vregs, VPU only).
            m = pred_ref[:, 0, :, :].astype(jnp.float32)      # (B, R, 128)
            for c in range(1, num_classes):
                m = jnp.maximum(m, pred_ref[:, c, :, :].astype(jnp.float32))
            # Pass 2: sum-exp + target-logit gather via per-class selects.
            s = jnp.zeros_like(m)
            tl = jnp.zeros_like(m)
            for c in range(num_classes):
                xc = pred_ref[:, c, :, :].astype(jnp.float32)
                s = s + jnp.exp(xc - m)
                tl = tl + jnp.where(t == c, xc, 0.0)
        else:
            # Large-C fallback: vectorized over the class axis; iota kept tiny.
            x = pred_ref[...].astype(jnp.float32)             # (B, C, R, 128)
            m = jnp.max(x, axis=1)                            # (B, R, 128)
            s = jnp.sum(jnp.exp(x - m[:, None]), axis=1)      # (B, R, 128)
            cid = jax.lax.broadcasted_iota(jnp.int32, (1, num_classes, 1, 1), 1)
            tl = jnp.sum(jnp.where(cid == t[:, None], x, 0.0), axis=1)

        lse = jnp.log(s) + m
        loss = jnp.where(t >= 0, lse - tl, 0.0)               # (B, R, 128)

        # Accumulate true per-lane partials (sum over the R/sublane axis only);
        # the cross-lane sum + final min happen in the JAX wrapper.
        out_ref[...] = out_ref[...] + jnp.sum(loss, axis=1, keepdims=True)

    return kernel


def min_loss(predictions, targets):
    """predictions: (N, C, H, W) float; targets: (N, H, W) int -> f32 scalar."""
    N, C, H, W = predictions.shape
    HW = H * W
    pred_itemsize = jnp.dtype(predictions.dtype).itemsize

    # int8 targets when they fit (big HBM-traffic win for small C).
    use_i8 = C <= 127
    tgt_dtype = jnp.int8 if use_i8 else jnp.int32
    tgt_itemsize = jnp.dtype(tgt_dtype).itemsize

    # ---- tile selection ----
    TARGET_TILE_BYTES = 4 << 20                 # ~4 MiB per (pred + tgt) tile
    # Cap B_TILE so the parallel batch axis has >= 2 blocks whenever N >= 2
    # (keeps both v7x TensorCores busy; harmless on v5e/v6e).
    B_TILE = min(8, max(1, (N + 1) // 2))
    hw_blocks = pl.cdiv(HW, 128)

    def rbytes(bt):                              # bytes per 128-wide spatial block
        return bt * 128 * (C * pred_itemsize + tgt_itemsize)

    # For very large C, shrink the batch tile (not the spatial tile) so lanes
    # stay dense and the tile fits the VMEM budget.
    while B_TILE > 1 and rbytes(B_TILE) * min(hw_blocks, 32) > TARGET_TILE_BYTES:
        B_TILE //= 2

    max_r = max(1, TARGET_TILE_BYTES // rbytes(B_TILE))
    if hw_blocks <= max_r:
        R_TILE = hw_blocks                      # single spatial step, full extent
        r_total = hw_blocks
    else:
        # Multiple of 32 sublanes: valid second-minor block dim for f32/bf16/int8.
        R_TILE = max(32, (max_r // 32) * 32)
        r_total = pl.cdiv(hw_blocks, R_TILE) * R_TILE
    hw_pad = r_total * 128
    n_pad = pl.cdiv(N, B_TILE) * B_TILE

    # ---- layout: contiguous reshapes only (no HBM transpose) ----
    pred = predictions.reshape(N, C, HW)
    tgt = targets.astype(tgt_dtype).reshape(N, 1, HW)
    if hw_pad != HW:
        pred = jnp.pad(pred, ((0, 0), (0, 0), (0, hw_pad - HW)))
        tgt = jnp.pad(tgt, ((0, 0), (0, 0), (0, hw_pad - HW)), constant_values=-1)
    if n_pad != N:
        pred = jnp.pad(pred, ((0, n_pad - N), (0, 0), (0, 0)))
        tgt = jnp.pad(tgt, ((0, n_pad - N), (0, 0), (0, 0)), constant_values=-1)
    pred = pred.reshape(n_pad, C, r_total, 128)
    tgt = tgt.reshape(n_pad, 1, r_total, 128)

    grid = (n_pad // B_TILE, r_total // R_TILE)
    kernel = _make_kernel(C, unroll=(C <= 64))

    sums = pl.pallas_call(
        kernel,
        out_shape=jax.ShapeDtypeStruct((n_pad, 1, 128), jnp.float32),
        grid_spec=pltpu.PrefetchScalarGridSpec(
            num_scalar_prefetch=0,
            grid=grid,
            in_specs=[
                pl.BlockSpec((B_TILE, C, R_TILE, 128), lambda bi, ri: (bi, 0, ri, 0)),
                pl.BlockSpec((B_TILE, 1, R_TILE, 128), lambda bi, ri: (bi, 0, ri, 0)),
            ],
            out_specs=pl.BlockSpec((B_TILE, 1, 128), lambda bi, ri: (bi, 0, 0)),
        ),
        compiler_params=pltpu.CompilerParams(
            # Batch axis: independent (megacore-shardable on v7x);
            # spatial axis: reduction -> serial, output-resident accumulator.
            dimension_semantics=("parallel", "arbitrary"),
            vmem_limit_bytes=32 * 1024 * 1024,
        ),
    )(pred, tgt)

    # Per-batch CE sums = cross-lane sum of the lane partials; final min in JAX.
    per_batch = jnp.sum(sums[:N, 0, :], axis=-1)
    return jnp.min(per_batch)


def _reference(predictions, targets):
    """Pure-JAX reference matching F.cross_entropy(...,'none').sum([1,2]).min()."""
    logits = jnp.transpose(predictions, (0, 2, 3, 1)).astype(jnp.float32)  # (N,H,W,C)
    logz = jax.nn.logsumexp(logits, axis=-1)                               # (N,H,W)
    tgt_logit = jnp.take_along_axis(
        logits, targets.astype(jnp.int32)[..., None], axis=-1)[..., 0]
    losses = logz - tgt_logit                                              # (N,H,W)
    return jnp.min(jnp.sum(losses, axis=(1, 2)))


if __name__ == "__main__":
    key = jax.random.PRNGKey(0)
    k_pred, k_tgt = jax.random.split(key)

    N, C, H, W = 2, 4, 16, 16
    predictions = jax.random.normal(k_pred, (N, C, H, W), dtype=jnp.float32)
    targets = jax.random.randint(k_tgt, (N, H, W), 0, C, dtype=jnp.int32)

    result = jax.block_until_ready(min_loss(predictions, targets))
    expected = _reference(predictions, targets)

    assert jnp.allclose(result, expected, rtol=1e-5, atol=1e-5), (result, expected)
    print("KERNEL_OK")
</pallas_src>

<mosaic_0001>
module attributes {stable_mosaic.version = 11 : i64} {
  func.func @kernel(%arg0: i32, %arg1: i32, %arg2: memref<1x4x2x128xf32, #tpu.memory_space<vmem>>, %arg3: memref<1x1x2x128xi8, #tpu.memory_space<vmem>>, %arg4: memref<1x1x128xf32, #tpu.memory_space<vmem>>) attributes {dimension_semantics = [#tpu.dimension_semantics<parallel>, #tpu.dimension_semantics<arbitrary>], iteration_bounds = array<i64: 2, 1>, scalar_prefetch = 0 : i64, scratch_operands = 0 : i64, tpu.core_type = #tpu.core_type<tc>, window_params = [{transform_indices = @transform_0, window_bounds = array<i64: 1, 4, 2, 128>}, {transform_indices = @transform_1, window_bounds = array<i64: 1, 1, 2, 128>}, {transform_indices = @transform_2, window_bounds = array<i64: 1, 1, 128>}]} {
    %c0_i32 = arith.constant 0 : i32
    %0 = arith.cmpi eq, %arg1, %c0_i32 : i32
    %1 = arith.extui %0 : i1 to i32
    %c0_i32_0 = arith.constant 0 : i32
    %2 = arith.cmpi ne, %1, %c0_i32_0 : i32
    scf.if %2 {
      %cst_48 = arith.constant 0.000000e+00 : f32
      %71 = vector.broadcast %cst_48 : f32 to vector<1x1x128xf32>
      %c0_49 = arith.constant 0 : index
      %c0_50 = arith.constant 0 : index
      %c0_51 = arith.constant 0 : index
      %72 = vector.load %arg4[%c0_49, %c0_50, %c0_51] : memref<1x1x128xf32, #tpu.memory_space<vmem>>, vector<1x1x128xf32>
      tpu.vector_store %arg4[%c0_49, %c0_50, %c0_51], %71 {strides = array<i32>} : memref<1x1x128xf32, #tpu.memory_space<vmem>>, vector<1x1x128xf32>,
    } else {
    }
    %c0 = arith.constant 0 : index
    %c0_1 = arith.constant 0 : index
    %c0_2 = arith.constant 0 : index
    %c0_3 = arith.constant 0 : index
    %3 = vector.load %arg3[%c0, %c0_1, %c0_2, %c0_3] : memref<1x1x2x128xi8, #tpu.memory_space<vmem>>, vector<1x1x2x128xi8>
    %4 = vector.shape_cast %3 : vector<1x1x2x128xi8> to vector<1x2x128xi8>
    %5 = arith.extsi %4 : vector<1x2x128xi8> to vector<1x2x128xi32>
    %c0_4 = arith.constant 0 : index
    %c0_5 = arith.constant 0 : index
    %c0_6 = arith.constant 0 : index
    %c0_7 = arith.constant 0 : index
    %6 = vector.load %arg2[%c0_4, %c0_5, %c0_6, %c0_7] : memref<1x4x2x128xf32, #tpu.memory_space<vmem>>, vector<1x1x2x128xf32>
    %7 = vector.shape_cast %6 : vector<1x1x2x128xf32> to vector<1x2x128xf32>
    %c0_8 = arith.constant 0 : index
    %c1 = arith.constant 1 : index
    %c0_9 = arith.constant 0 : index
    %c0_10 = arith.constant 0 : index
    %8 = vector.load %arg2[%c0_8, %c1, %c0_9, %c0_10] : memref<1x4x2x128xf32, #tpu.memory_space<vmem>>, vector<1x1x2x128xf32>
    %9 = vector.shape_cast %8 : vector<1x1x2x128xf32> to vector<1x2x128xf32>
    %10 = arith.maximumf %7, %9 : vector<1x2x128xf32>
    %c0_11 = arith.constant 0 : index
    %c2 = arith.constant 2 : index
    %c0_12 = arith.constant 0 : index
    %c0_13 = arith.constant 0 : index
    %11 = vector.load %arg2[%c0_11, %c2, %c0_12, %c0_13] : memref<1x4x2x128xf32, #tpu.memory_space<vmem>>, vector<1x1x2x128xf32>
    %12 = vector.shape_cast %11 : vector<1x1x2x128xf32> to vector<1x2x128xf32>
    %13 = arith.maximumf %10, %12 : vector<1x2x128xf32>
    %c0_14 = arith.constant 0 : index
    %c3 = arith.constant 3 : index
    %c0_15 = arith.constant 0 : index
    %c0_16 = arith.constant 0 : index
    %14 = vector.load %arg2[%c0_14, %c3, %c0_15, %c0_16] : memref<1x4x2x128xf32, #tpu.memory_space<vmem>>, vector<1x1x2x128xf32>
    %15 = vector.shape_cast %14 : vector<1x1x2x128xf32> to vector<1x2x128xf32>
    %16 = arith.maximumf %13, %15 : vector<1x2x128xf32>
    %cst = arith.constant 0.000000e+00 : f32
    %17 = vector.broadcast %cst : f32 to vector<1x2x128xf32>
    %cst_17 = arith.constant 0.000000e+00 : f32
    %18 = vector.broadcast %cst_17 : f32 to vector<1x2x128xf32>
    %c0_18 = arith.constant 0 : index
    %c0_19 = arith.constant 0 : index
    %c0_20 = arith.constant 0 : index
    %c0_21 = arith.constant 0 : index
    %19 = vector.load %arg2[%c0_18, %c0_19, %c0_20, %c0_21] : memref<1x4x2x128xf32, #tpu.memory_space<vmem>>, vector<1x1x2x128xf32>
    %20 = vector.shape_cast %19 : vector<1x1x2x128xf32> to vector<1x2x128xf32>
    %21 = arith.subf %20, %16 : vector<1x2x128xf32>
    %22 = math.exp %21 : vector<1x2x128xf32>
    %23 = arith.addf %17, %22 : vector<1x2x128xf32>
    %c0_i32_22 = arith.constant 0 : i32
    %24 = vector.broadcast %c0_i32_22 : i32 to vector<1x2x128xi32>
    %25 = arith.cmpi eq, %5, %24 : vector<1x2x128xi32>
    %cst_23 = arith.constant 0.000000e+00 : f32
    %26 = vector.broadcast %cst_23 : f32 to vector<1x2x128xf32>
    %27 = arith.select %25, %20, %26 : vector<1x2x128xi1>, vector<1x2x128xf32>
    %28 = arith.addf %18, %27 : vector<1x2x128xf32>
    %c0_24 = arith.constant 0 : index
    %c1_25 = arith.constant 1 : index
    %c0_26 = arith.constant 0 : index
    %c0_27 = arith.constant 0 : index
    %29 = vector.load %arg2[%c0_24, %c1_25, %c0_26, %c0_27] : memref<1x4x2x128xf32, #tpu.memory_space<vmem>>, vector<1x1x2x128xf32>
    %30 = vector.shape_cast %29 : vector<1x1x2x128xf32> to vector<1x2x128xf32>
    %31 = arith.subf %30, %16 : vector<1x2x128xf32>
    %32 = math.exp %31 : vector<1x2x128xf32>
    %33 = arith.addf %23, %32 : vector<1x2x128xf32>
    %c1_i32 = arith.constant 1 : i32
    %34 = vector.broadcast %c1_i32 : i32 to vector<1x2x128xi32>
    %35 = arith.cmpi eq, %5, %34 : vector<1x2x128xi32>
    %cst_28 = arith.constant 0.000000e+00 : f32
    %36 = vector.broadcast %cst_28 : f32 to vector<1x2x128xf32>
    %37 = arith.select %35, %30, %36 : vector<1x2x128xi1>, vector<1x2x128xf32>
    %38 = arith.addf %28, %37 : vector<1x2x128xf32>
    %c0_29 = arith.constant 0 : index
    %c2_30 = arith.constant 2 : index
    %c0_31 = arith.constant 0 : index
    %c0_32 = arith.constant 0 : index
    %39 = vector.load %arg2[%c0_29, %c2_30, %c0_31, %c0_32] : memref<1x4x2x128xf32, #tpu.memory_space<vmem>>, vector<1x1x2x128xf32>
    %40 = vector.shape_cast %39 : vector<1x1x2x128xf32> to vector<1x2x128xf32>
    %41 = arith.subf %40, %16 : vector<1x2x128xf32>
    %42 = math.exp %41 : vector<1x2x128xf32>
    %43 = arith.addf %33, %42 : vector<1x2x128xf32>
    %c2_i32 = arith.constant 2 : i32
    %44 = vector.broadcast %c2_i32 : i32 to vector<1x2x128xi32>
    %45 = arith.cmpi eq, %5, %44 : vector<1x2x128xi32>
    %cst_33 = arith.constant 0.000000e+00 : f32
    %46 = vector.broadcast %cst_33 : f32 to vector<1x2x128xf32>
    %47 = arith.select %45, %40, %46 : vector<1x2x128xi1>, vector<1x2x128xf32>
    %48 = arith.addf %38, %47 : vector<1x2x128xf32>
    %c0_34 = arith.constant 0 : index
    %c3_35 = arith.constant 3 : index
    %c0_36 = arith.constant 0 : index
    %c0_37 = arith.constant 0 : index
    %49 = vector.load %arg2[%c0_34, %c3_35, %c0_36, %c0_37] : memref<1x4x2x128xf32, #tpu.memory_space<vmem>>, vector<1x1x2x128xf32>
    %50 = vector.shape_cast %49 : vector<1x1x2x128xf32> to vector<1x2x128xf32>
    %51 = arith.subf %50, %16 : vector<1x2x128xf32>
    %52 = math.exp %51 : vector<1x2x128xf32>
    %53 = arith.addf %43, %52 : vector<1x2x128xf32>
    %c3_i32 = arith.constant 3 : i32
    %54 = vector.broadcast %c3_i32 : i32 to vector<1x2x128xi32>
    %55 = arith.cmpi eq, %5, %54 : vector<1x2x128xi32>
    %cst_38 = arith.constant 0.000000e+00 : f32
    %56 = vector.broadcast %cst_38 : f32 to vector<1x2x128xf32>
    %57 = arith.select %55, %50, %56 : vector<1x2x128xi1>, vector<1x2x128xf32>
    %58 = arith.addf %48, %57 : vector<1x2x128xf32>
    %59 = math.log %53 : vector<1x2x128xf32>
    %60 = arith.addf %59, %16 : vector<1x2x128xf32>
    %c0_i32_39 = arith.constant 0 : i32
    %61 = vector.broadcast %c0_i32_39 : i32 to vector<1x2x128xi32>
    %62 = arith.cmpi sge, %5, %61 : vector<1x2x128xi32>
    %63 = arith.subf %60, %58 : vector<1x2x128xf32>
    %cst_40 = arith.constant 0.000000e+00 : f32
    %64 = vector.broadcast %cst_40 : f32 to vector<1x2x128xf32>
    %65 = arith.select %62, %63, %64 : vector<1x2x128xi1>, vector<1x2x128xf32>
    %c0_41 = arith.constant 0 : index
    %c0_42 = arith.constant 0 : index
    %c0_43 = arith.constant 0 : index
    %66 = vector.load %arg4[%c0_41, %c0_42, %c0_43] : memref<1x1x128xf32, #tpu.memory_space<vmem>>, vector<1x1x128xf32>
    %cst_44 = arith.constant dense<0.000000e+00> : vector<1x128xf32>
    %67 = vector.multi_reduction <add>, %65, %cst_44 [1] : vector<1x2x128xf32> to vector<1x128xf32>
    %68 = vector.shape_cast %67 : vector<1x128xf32> to vector<1x1x128xf32>
    %69 = arith.addf %66, %68 : vector<1x1x128xf32>
    %c0_45 = arith.constant 0 : index
    %c0_46 = arith.constant 0 : index
    %c0_47 = arith.constant 0 : index
    %70 = vector.load %arg4[%c0_45, %c0_46, %c0_47] : memref<1x1x128xf32, #tpu.memory_space<vmem>>, vector<1x1x128xf32>
    tpu.vector_store %arg4[%c0_45, %c0_46, %c0_47], %69 {strides = array<i32>} : memref<1x1x128xf32, #tpu.memory_space<vmem>>, vector<1x1x128xf32>,
    return
  }
  func.func @transform_0(%arg0: i32, %arg1: i32) -> (i32, i32, i32, i32) {
    %c0_i32 = arith.constant 0 : i32
    %c0_i32_0 = arith.constant 0 : i32
    %c0_i32_1 = arith.constant 0 : i32
    return %arg0, %c0_i32, %arg1, %c0_i32_0 : i32, i32, i32, i32
  }
  func.func @transform_1(%arg0: i32, %arg1: i32) -> (i32, i32, i32, i32) {
    %c0_i32 = arith.constant 0 : i32
    %c0_i32_0 = arith.constant 0 : i32
    %c0_i32_1 = arith.constant 0 : i32
    return %arg0, %c0_i32, %arg1, %c0_i32_0 : i32, i32, i32, i32
  }
  func.func @transform_2(%arg0: i32, %arg1: i32) -> (i32, i32, i32) {
    %c0_i32 = arith.constant 0 : i32
    %c0_i32_0 = arith.constant 0 : i32
    %c0_i32_1 = arith.constant 0 : i32
    return %arg0, %c0_i32, %c0_i32_0 : i32, i32, i32
  }
}

</mosaic_0001>

<bundles_post_ra>
// kernel: tpu_custom_call.1
= control target key start
LH: loop header
LB: loop body
LE: loop exit
PB: predicated region body
PF: predicated region fallthrough
CT: control target
= control target key end

     0   :  { %7 = vsyncpa [#allocation3], 0  ;;  %s814_s0 = inlined_call_operand.hbm [shape: f32[2,4,2,128], index: 0, kind: input, shape index: {}]   ;;  %s815_s1 = inlined_call_operand.hbm [shape: s8[2,1,2,128], index: 1, kind: input, shape index: {}]   ;;  %s816_s2 = inlined_call_operand.hbm [shape: f32[2,1,128], index: 2, kind: output, shape index: {}]  }
   0x1   :  { %9 = vsyncpa [#allocation3 + $0x1], 0 }
   0x2   :  { %10 = vsyncpa [#allocation6], 0 }
   0x3   :  { %12 = vsyncpa [#allocation6 + $0x1], 0 }
   0x4   :  { %13 = vsyncpa [#allocation4], 0 }
   0x5   :  { %15 = vsyncpa [#allocation4 + $0x1], 0  ;;  %s645_s9 = smov 0   ;;  %s647_s10 = smov 0  }
   0x6   :  { %s649_s11 = smov 0   ;;  %s651_s12 = smov 0  }
   0x7   :  { %s653_s13 = smov 0   ;;  %s655_s14 = smov 0  }
   0x8 LB: > { %s385_s15 = sadd.s32 4294967295, %s622_s14   ;;  %s386_s16 = sadd.s32 4294967294, %s622_s14   ;;  %s622_s14 = sphi %s655_s14, %s21_s14   ;;  %s618_s13 = sphi %s653_s13, %s828_s13   ;;  %s614_s12 = sphi %s651_s12, %s827_s12   ;;  %s610_s11 = sphi %s649_s11, %s826_s11   ;;  %s606_s10 = sphi %s647_s10, %s825_s10   ;;  %s602_s9 = sphi %s645_s9, %s824_s9  }
   0x9   : > { %s33_s17 = sadd.s32 1, %s618_s13  ;;  %s42_s18 = sadd.s32 1, %s610_s11 }
   0xa   : > { %p35_p0 = scmp.ge.s32.totalorder %s33_s17, 2  ;;  %p49_p1 = scmp.ne.s32.totalorder %s610_s11, %s606_s10 }
   0xb   : > { %p50_p2 = scmp.eq.s32.totalorder %s622_s14, 0  ;;  %p55_p3 = scmp.ne.s32.totalorder %s606_s10, %s602_s9 }
   0xc   : > { %s830_s17 = smov (%p35_p0, %s33_s17), 0  ;;  %p56_p5 = scmp.eq.s32.totalorder %s385_s15, 0 }
   0xd   : > { %p686_p4 = por %p50_p2, %p49_p1  ;;  %s37_s20 = ssub.s32 %s618_s13, %s830_s17 }
   0xe   : > { %p107_p6 = scmp.eq.s32.totalorder %s385_s15, 1  ;;  %p40_p7 = scmp.eq.s32.totalorder %s37_s20, 0 }
   0xf   : > { %p692_p8 = por %p56_p5, %p55_p3  ;;  %p113_p10 = scmp.eq.s32.totalorder %s386_s16, 1 }
  0x10   : > { %p696_p9 = por %p107_p6, %p49_p1  ;;  %p419_p13 = scmp.lt.s32.totalorder %s622_s14, 2 }
  0x11   : > { %s701_s23 = scalar_select %p40_p7, %s610_s11, %s42_s18  }
  0x12   : > { %p703_p11 = por %p113_p10, %p55_p3  ;;  %s710_s25 = sand.u32 1, %s610_s11  }
  0x13   : > { %s389_s26 = sshll.u32 %s710_s25, 3  ;;  %s401_s27 = sshll.u32 %s618_s13, 7 }
  0x14   : > { %s144_s30 = scalar_lea.hbm %s814_s0, %s401_s27  ;;  %s137_s3 = scalar_lea.vmem [#allocation2], %s389_s26 }
  0x15   : > { %s145_s4 = sshll.u32 %s137_s3, 4  ;;  %p719_p0 = pnand %p419_p13, %p686_p4  ;;  %s146_s4 = int_to_ptr.vmem [resolvable:$true] %s145_s4 }
  0x16   : > { %p393_p1 = scmp.ge.s32.totalorder %s622_s14, 1  ;;  %s134_s6 = scalar_lea.sflag [#allocation3], %s710_s25 }
  0x17   : > { %p484_p2 = pneg %p719_p0  ;;  %s495_s7 = scalar_lea.vmem %s146_s4, 128 }
  0x18   : > { %p496_p3 = scmp.ne.s32.totalorder %s146_s4, %s495_s7  ;;  %s624_s8 = smov [#allocation2]  }
  0x19   : > { %s500_s15 = sshll.u32 %s624_s8, 4  ;;  %s501_s15 = int_to_ptr.vmem [resolvable:$false] %s500_s15 }
  0x1a   : > { %p498_p5 = pnand %p496_p3, %p484_p2  ;;  %s502_s16 = scalar_lea.vmem %s501_s15, 256 }
  0x1b   : > { %p503_p4 = scmp.lt.s32.totalorder %s146_s4, %s501_s15  ;;  %p504_p7 = scmp.lt.s32.totalorder %s502_s16, %s495_s7 }
  0x1c   : > { %p499_p6 = pneg %p498_p5 }
  0x1d   : > { %p505_p10 = por %p504_p7, %p503_p4 }
  0x1f   : > { %p506_p13 = pnand %p505_p10, %p499_p6 }
  0x21   : > { %509 = shalt.err (!%p506_p13)
}
  0x22   : > { %s625_s18 = smov 32   ;;  %s626_s19 = smov 2  }
  0x23   : > { %411 = dma.hbm_to_vmem [thread:$0]  (!%p719_p0), %s144_s30, 128, %s146_s4, %s134_s6, %s625_s18, %s625_s18, %s626_s19  }
  0x24   : > { %p171_p3 = scmp.lt.s32.totalorder %s622_s14, 3  ;;  %s392_s20 = sshll.u32 %s618_s13, 4 }
  0x25   : > { %s164_s29 = scalar_lea.hbm %s815_s1, %s392_s20  ;;  %s158_s3 = scalar_lea.vmem [#allocation5], %s710_s25 }
  0x26   : > { %p736_p5 = pnand %p393_p1, %p171_p3  ;;  %s166_s7 = sshll.u32 %s158_s3, 4  ;;  %s167_s7 = int_to_ptr.vmem [resolvable:$true] %s166_s7 }
  0x27   : > { %s156_s8 = scalar_lea.sflag [#allocation6], %s710_s25  ;;  %s523_s15 = scalar_lea.vmem %s167_s7, 16 }
  0x28   : > { %p524_p6 = scmp.ne.s32.totalorder %s167_s7, %s523_s15  ;;  %s627_s30 = smov [#allocation5]  }
  0x29   : > { %s528_s4 = sshll.u32 %s627_s30, 4  ;;  %s529_s4 = int_to_ptr.vmem [resolvable:$false] %s528_s4 }
  0x2a   : > { %p526_p4 = pnand %p524_p6, %p484_p2  ;;  %s530_s6 = scalar_lea.vmem %s529_s4, 32 }
  0x2b   : > { %p531_p1 = scmp.lt.s32.totalorder %s167_s7, %s529_s4  ;;  %p532_p10 = scmp.lt.s32.totalorder %s530_s6, %s523_s15 }
  0x2c   : > { %p527_p7 = pneg %p526_p4 }
  0x2d   : > { %p533_p13 = por %p532_p10, %p531_p1 }
  0x2f   : > { %p534_p3 = pnand %p533_p13, %p527_p7 }
  0x31   : > { %537 = shalt.err (!%p534_p3)
}
  0x32   : > { %414 = dma.hbm_to_vmem [thread:$0]  (!%p719_p0), %s164_s29, 16, %s167_s7, %s156_s8  }
  0x33   : > { %175 = sbr.rel (%p736_p5) target bundleno = 141 (0x8d), region = 28  ;;  %s753_s25 = sand.u32 (!%p736_p5), 1, %s606_s10  }
  0x34   : > { %s394_s16 = sshll.u32 (!%p736_p5), %s753_s25, 3  ;;  %s178_s18 = scalar_lea.sflag (!%p736_p5), [#allocation3], %s753_s25 }
  0x35   : > { %s181_s19 = scalar_lea.vmem (!%p736_p5), [#allocation2], %s394_s16 }
  0x38   : > { %589 = dma.done.wait (%p692_p8), %s178_s18, 128  }
  0x39   : > { %591 = vsyncadd (%p692_p8), %s178_s18, 4294967168  ;;  %s187_s5 = scalar_lea.sflag [#allocation6], %s753_s25  ;;  %s189_s20 = scalar_lea.vmem [#allocation5], %s753_s25 }
  0x3a   : > { %593 = dma.done.wait (%p692_p8), %s187_s5, 16  }
  0x3b   : > { %595 = vsyncadd (%p692_p8), %s187_s5, 4294967280  ;;  %s768_s26 = scalar_lea.vmem [#allocation7], %s753_s25  ;;  %v628_v0 = vmov 0.0   ;;  %v220_v1 = vld [vmem:[%s181_s19] sm:$0x3]  ;;  %vm265_vm5 = vcmask 1041408  }
  0x3c   : > { %217 = vst [vmem:[%s768_s26] sm:$0x1] %v628_v0  ;;  %v395_v2 = vld [vmem:[%s181_s19 + $0x2] sm:$0x3]  ;;  %v396_v4 = vld [vmem:[%s181_s19 + $0x4] sm:$0x3]  ;;  %s398_s21 = sshll.u32 %s614_s12, 4 }
  0x3d   : > { %v223_v3 = vmax.f32 %v220_v1, %v395_v2  ;;  %v397_v5 = vld [vmem:[%s181_s19 + $0x6] sm:$0x3]  ;;  %v218_v18 = vld [vmem:[%s189_s20] sm:$0x1]  ;;  %s288_s27 = sshll.u32 %s768_s26, 4  ;;  %s286_s3 = scalar_lea.hbm %s816_s2, %s398_s21  ;;  %s289_s27 = int_to_ptr.vmem [resolvable:$true] %s288_s27 }
  0x3e   : > { %v219_v22 = vunpack.c.0.s8 %v218_v18  ;;  %s276_s7 = scalar_lea.sflag [#allocation4], %s753_s25  ;;  %s538_s8 = scalar_lea.vmem %s289_s27, 16 }
  0x3f   : > { %v226_v6 = vmax.f32 %v223_v3, %v396_v4  ;;  %p539_p8 = scmp.ne.s32.totalorder %s289_s27, %s538_s8  ;;  %s629_s15 = smov [#allocation7]  }
  0x40   : > { %vm234_vm0 = vcmp.eq.s32.totalorder %v219_v22, 0  ;;  %vm241_vm1 = vcmp.eq.s32.totalorder %v219_v22, 1  ;;  %vm248_vm2 = vcmp.eq.s32.totalorder %v219_v22, 2  ;;  %vm255_vm3 = vcmp.eq.s32.totalorder %v219_v22, 3  ;;  %s542_s30 = sshll.u32 %s629_s15, 4  ;;  %s543_s30 = int_to_ptr.vmem [resolvable:$false] %s542_s30 }
  0x41   : > { %v229_v7 = vmax.f32 %v226_v6, %v397_v5  ;;  %v235_v25 = vsel %vm234_vm0, %v220_v1, 0.0  ;;  %v242_v26 = vsel %vm241_vm1, %v395_v2, 0.0  ;;  %v249_v28 = vsel %vm248_vm2, %v396_v4, 0.0  ;;  %p540_p0 = pnand %p539_p8, %p696_p9  ;;  %s544_s4 = scalar_lea.vmem %s543_s30, 32 }
  0x42   : > { %v243_v27 = vadd.f32 %v242_v26, %v235_v25  ;;  %v256_v30 = vsel %vm255_vm3, %v397_v5, 0.0  ;;  %vm261_vm4 = vcmp.ge.s32.totalorder %v219_v22, 0  ;;  %p545_p5 = scmp.lt.s32.totalorder %s289_s27, %s543_s30  ;;  %p546_p6 = scmp.lt.s32.totalorder %s544_s4, %s538_s8 }
  0x43   : > { %v230_v8 = vsub.f32 %v220_v1, %v229_v7  ;;  %v237_v9 = vsub.f32 %v395_v2, %v229_v7  ;;  %v244_v10 = vsub.f32 %v396_v4, %v229_v7  ;;  %v251_v11 = vsub.f32 %v397_v5, %v229_v7  ;;  %v264_v43 = vld [vmem:[%s768_s26] sm:$0x1]  ;;  %p541_p2 = pneg %p540_p0 }
  0x44   : > { %v250_v29 = vadd.f32 %v249_v28, %v243_v27  ;;  %p547_p4 = por %p546_p6, %p545_p5 }
  0x45   : > { %v231_v12 = vmul.f32 1.442695, %v230_v8  ;;  %v238_v13 = vmul.f32 1.442695, %v237_v9  ;;  %v245_v14 = vmul.f32 1.442695, %v244_v10 }
  0x46   : > { %v252_v15 = vmul.f32 1.442695, %v251_v11  ;;  %v257_v32 = vadd.f32 %v256_v30, %v250_v29  ;;  %p548_p7 = pnand %p547_p4, %p541_p2 }
  0x47   : > { %472 = vpow2.f32 %v231_v12 }
  0x48   : > { %474 = vpow2.f32 %v238_v13 }
  0x49   : > { %476 = vpow2.f32 %v245_v14 }
  0x4a   : > { %478 = vpow2.f32 %v252_v15 }
  0x54   : > { %v473_v16 = vpop.eup %472 }
  0x55   : > { %v475_v17 = vpop.eup %474 }
  0x56   : > { %v477_v19 = vpop.eup %476  ;;  %v240_v20 = vadd.f32 %v475_v17, %v473_v16 }
  0x57   : > { %v479_v21 = vpop.eup %478 }
  0x58   : > { %v247_v23 = vadd.f32 %v477_v19, %v240_v20 }
  0x5a   : > { %v254_v24 = vadd.f32 %v479_v21, %v247_v23 }
  0x5c   : > { %480 = vlog2.f32 %v254_v24 }
  0x69   : > { %v481_v31 = vpop.eup %480 }
  0x6a   : > { %v259_v33 = vmul.f32 0.6931472, %v481_v31 }
  0x6c   : > { %v260_v34 = vadd.f32 %v259_v33, %v229_v7 }
  0x6e   : > { %v262_v35 = vsub.f32 %v260_v34, %v257_v32 }
  0x70   : > { %v263_v36 = vsel %vm261_vm4, %v262_v35, 0.0 }
  0x71   : > { %v266_v37 = vsel %vm265_vm5, %v263_v36, 0.0 }
  0x72   : > { %v267_v38 = vrot.slane %v266_v37, 4 }
  0x74   : > { %v268_v39 = vadd.f32 %v267_v38, %v266_v37 }
  0x76   : > { %v269_v40 = vrot.slane %v268_v39, 2 }
  0x78   : > { %v270_v41 = vadd.f32 %v269_v40, %v268_v39 }
  0x7a   : > { %v271_v42 = vrot.slane %v270_v41, 1 }
  0x7c   : > { %v272_v44 = vadd.f32 %v271_v42, %v270_v41 }
  0x7e   : > { %v273_v45 = vadd.f32 %v272_v44, %v264_v43 }
  0x80   : > { %274 = vst [vmem:[%s768_s26] sm:$0x1] %v273_v45 }
  0x81   : > { %551 = shalt.err (!%p548_p7)
}
  0x82   : > { %s552_s12 = scalar_lea.hbm %s286_s3, 16  ;;  %s556_s16 = scalar_lea.hbm %s816_s2, 32 }
  0x83   : > { %p553_p1 = scmp.ne.s32.totalorder %s286_s3, %s552_s12  ;;  %p557_p3 = scmp.lt.s32.totalorder %s286_s3, %s816_s2 }
  0x84   : > { %p558_p8 = scmp.lt.s32.totalorder %s556_s16, %s552_s12 }
  0x85   : > { %p554_p10 = pnand %p553_p1, %p696_p9 }
  0x86   : > { %p559_p0 = por %p558_p8, %p557_p3 }
  0x87   : > { %p555_p13 = pneg %p554_p10 }
  0x89   : > { %p560_p12 = pnand %p559_p0, %p555_p13 }
  0x8b   : > { %563 = shalt.err (!%p560_p12)
}
  0x8c   : > { %406 = dma.vmem_to_hbm [thread:$0]  (%p696_p9), %s289_s27, 16, %s286_s3, %s276_s7  }
  0x8d PF: > { %s300_s5 = sand.u32 1, %s602_s9   ;;  %p823_p2 = scmp.ge.s32.totalorder %s622_s14, 2 }
  0x8e   : > { %s301_s20 = scalar_lea.sflag [#allocation4], %s300_s5 }
  0x8f   : > { %p416_p5 = pnand %p823_p2, %p703_p11 }
  0x91   : > { %p417_p6 = pneg %p416_p5 }
  0x93   : > { %597 = dma.done.wait (%p417_p6), %s301_s20, 16  }
  0x94   : > { %599 = vsyncadd (%p417_p6), %s301_s20, 4294967280  ;;  %s21_s14 = sadd.s32 1, %s622_s14   ;;  %s824_s9 = smov %s606_s10 }
  0x95   : > { %p18_p4 = scmp.ge.s32.totalorder %s21_s14, 4   ;;  %s825_s10 = smov %s610_s11 }
  0x96   : > { %s826_s11 = smov %s701_s23  ;;  %s827_s12 = smov %s618_s13 }
  0x97   : > { %s828_s13 = smov %s830_s17  ;;  %20 = sbr.rel (!%p18_p4) target bundleno = 8 (0x8), region = 93 }
  0x9c   :  { %305 = vsyncpa [#allocation3], 1 }
  0x9d   :  { %307 = vsyncpa [#allocation3 + $0x1], 1 }
  0x9e   :  { %308 = vsyncpa [#allocation6], 1 }
  0x9f   :  { %310 = vsyncpa [#allocation6 + $0x1], 1 }
  0xa0   :  { %311 = vsyncpa [#allocation4], 1 }
  0xa1   :  { %313 = vsyncpa [#allocation4 + $0x1], 1 }

</bundles_post_ra>
